<compile_context>
chip_gen: v6e
topology: v6e:2x2x1
jax: 0.10.0
libtpu: 0.0.40
codegen_flags: <defaults>
</compile_context>

<pallas_src>
import functools

import jax
import jax.numpy as jnp
from jax.experimental import pallas as pl
from jax.experimental.pallas import tpu as pltpu

_INV_SQRT2 = 0.7071067811865476
_MIB = 1024 * 1024


def _gelu_exact(v):
    # nn.GELU() default == exact erf-based GELU, kept in f32.
    return 0.5 * v * (1.0 + jax.lax.erf(v * _INV_SQRT2))


def _gelu_tanh(v):
    # tanh approximation: transcendental goes to the EUP slot (v6e/v7x VALU
    # relief).  Numerically deviates from nn.GELU() exact erf — opt-in only.
    c = 0.7978845608028654  # sqrt(2/pi)
    return 0.5 * v * (1.0 + jnp.tanh(c * (v + 0.044715 * v * v * v)))


def mixer_block_kernel(x_ref,
                       wt1_ref, bt1_ref, wt2_ref, bt2_ref,     # token MLP
                       g2_ref, be2_ref,                        # layer_norm_2 affine
                       wc1t_ref, bc1_ref, wc2t_ref, bc2_ref,   # channel MLP (pre-T)
                       o_ref,
                       x1_ref,                                 # f32 VMEM scratch
                       *, block_b, token_dim, mc_block, approximate_gelu):
    f32 = jnp.float32
    mxu_dtype = wt1_ref.dtype                 # matmul operand dtype (bf16 or f32)
    t = token_dim
    mc = wc1t_ref.shape[-1]
    gelu = _gelu_tanh if approximate_gelu else _gelu_exact

    wt1 = wt1_ref[...]                        # (Mt, T)
    wt2 = wt2_ref[...]                        # (T, Mt)
    bt1 = bt1_ref[...]                        # (Mt, 1)  f32
    bt2 = bt2_ref[...]                        # (T, 1)   f32

    # ---- token mixing (on raw x; layer_norm_1 is dead code — see header) ----
    # Contract the token dim directly, writing each batch element's residual
    # straight into the f32 VMEM scratch (bounds live ranges; no concat copy).
    for b in range(block_b):                  # static unroll over the batch block
        r0 = b * t
        xb = x_ref[pl.ds(r0, t), :]           # (T, H)
        hb = jnp.dot(wt1, xb.astype(mxu_dtype),
                     preferred_element_type=f32) + bt1                 # (Mt, H)
        hb = gelu(hb)
        yb = jnp.dot(wt2, hb.astype(mxu_dtype),
                     preferred_element_type=f32) + bt2                 # (T, H)
        x1_ref[pl.ds(r0, t), :] = xb.astype(f32) + yb                  # residual

    x1 = x1_ref[...]                          # (Bb*T, H) f32 merged slab

    # ---- layer_norm_2 over the hidden dim (f32 statistics) ----
    mean = jnp.mean(x1, axis=-1, keepdims=True)
    var = jnp.mean(jnp.square(x1 - mean), axis=-1, keepdims=True)
    y = (x1 - mean) * jax.lax.rsqrt(var + 1e-5)
    y = y * g2_ref[...] + be2_ref[...]        # (1, H) affine broadcasts
    y_mxu = y.astype(mxu_dtype)               # hoisted: cast once for all chunks

    # ---- channel mixing on the merged slab, tiled over Mc ----
    acc0 = x1 + bc2_ref[...]                  # residual + output bias, f32
    n_mc = mc // mc_block
    if n_mc == 1:
        hc = jnp.dot(y_mxu, wc1t_ref[...],
                     preferred_element_type=f32) + bc1_ref[...]        # (Bb*T, Mc)
        hc = gelu(hc)
        acc = acc0 + jnp.dot(hc.astype(mxu_dtype), wc2t_ref[...],
                             preferred_element_type=f32)               # (Bb*T, H)
    else:
        def body(c, acc):
            col = pl.multiple_of(c * mc_block, mc_block)   # 128-aligned offsets
            hc = jnp.dot(y_mxu, wc1t_ref[:, pl.ds(col, mc_block)],
                         preferred_element_type=f32)
            hc = gelu(hc + bc1_ref[:, pl.ds(col, mc_block)])
            return acc + jnp.dot(hc.astype(mxu_dtype),
                                 wc2t_ref[pl.ds(col, mc_block), :],
                                 preferred_element_type=f32)
        acc = jax.lax.fori_loop(0, n_mc, body, acc0, unroll=(n_mc <= 8))

    o_ref[...] = acc.astype(o_ref.dtype)      # 2D lane-dense store, no reshape


def _vmem_capacity_bytes():
    try:
        return int(pltpu.get_tpu_info().vmem_capacity_bytes)
    except Exception:
        return 64 * _MIB                      # conservative (v7x) fallback


def _pick_mc_block(mc, requested):
    if requested is not None:
        assert mc % requested == 0, (mc, requested)
        assert requested == mc or requested % 128 == 0, requested
        return requested
    if mc <= 512:
        return mc
    for cand in (512, 384, 256, 128):         # 128-aligned chunks only
        if mc % cand == 0:
            return cand
    return mc                                  # no aligned divisor: single shot


def _estimate_vmem_bytes(block_b, t, h, mt, mc_block, x_item, out_item,
                         weight_bytes, single_buffer):
    rows = block_b * t
    io = rows * h
    b = 2 * io * x_item                        # input block, double-buffered
    b += 2 * io * out_item                     # output block, double-buffered
    b += weight_bytes * (1 if single_buffer else 2)
    b += io * 4                                # x1 f32 scratch
    b += 3 * io * 4                            # y / acc / misc f32 live values
    b += rows * mc_block * 4                   # channel-MLP gelu intermediate
    b += 2 * (mt * h + t * h) * 4              # token-MLP intermediates
    return b


def _pick_block_b(B, t, h, mt, mc_block, x_item, out_item, weight_bytes, cap):
    target = int(0.55 * cap)
    cands = [d for d in range(1, min(B, 8) + 1) if B % d == 0]
    # Keep grid >= 2 when possible so the "parallel" axis can be sharded
    # across v7x's two TensorCores.
    pref = [d for d in cands if B // d >= 2] or cands
    fit = [d for d in pref
           if _estimate_vmem_bytes(d, t, h, mt, mc_block, x_item, out_item,
                                   weight_bytes, True) <= target]
    return max(fit) if fit else min(pref)


def mixer_block(x, params, *, block_b=None, matmul_dtype=jnp.bfloat16,
                mc_block=None, single_buffer_weights=None,
                approximate_gelu=False):
    """MixerBlock forward.

    params = (wt1, bt1, wt2, bt2, g2, be2, wc1, bc1, wc2, bc2) in PyTorch
    nn.Linear layouts: weights (out_features, in_features), biases (1, out).
    matmul_dtype: MXU operand dtype (default bf16 on all generations);
    accumulation and all elementwise math stay f32.
    single_buffer_weights: None = try Buffered(1) and fall back automatically.
    """
    B, T, H = x.shape
    wt1, bt1, wt2, bt2, g2, be2, wc1, bc1, wc2, bc2 = params
    Mt = wt1.shape[0]
    Mc = wc1.shape[0]
    f32 = jnp.float32

    # --- one-time host-side weight re-layout: kernel needs no transposes ---
    wt1_k = wt1.astype(matmul_dtype)            # (Mt, T):  h = wt1 @ x_b
    wt2_k = wt2.astype(matmul_dtype)            # (T, Mt):  y = wt2 @ gelu(h)
    wc1t = wc1.T.astype(matmul_dtype)           # (H, Mc):  c = y @ wc1t
    wc2t = wc2.T.astype(matmul_dtype)           # (Mc, H)
    bt1c = bt1.reshape(Mt, 1).astype(f32)       # column bias for (Mt, H)
    bt2c = bt2.reshape(T, 1).astype(f32)        # column bias for (T, H)
    bc1r = bc1.reshape(1, Mc).astype(f32)
    bc2r = bc2.reshape(1, H).astype(f32)
    g2r = g2.reshape(1, H).astype(f32)
    be2r = be2.reshape(1, H).astype(f32)
    weights = (wt1_k, bt1c, wt2_k, bt2c, g2r, be2r, wc1t, bc1r, wc2t, bc2r)
    weight_bytes = sum(int(a.size) * a.dtype.itemsize for a in weights)

    mc_blk = _pick_mc_block(Mc, mc_block)
    cap = _vmem_capacity_bytes()
    x_item = x.dtype.itemsize
    out_item = x.dtype.itemsize

    if block_b is None:
        block_b = _pick_block_b(B, T, H, Mt, mc_blk, x_item, out_item,
                                weight_bytes, cap)
    assert B % block_b == 0, (B, block_b)
    grid = (B // block_b,)
    rows = block_b * T

    # Flat, lane-dense 2D I/O (free host-side reshape).
    x2d = x.reshape(B * T, H)

    kernel = functools.partial(mixer_block_kernel,
                               block_b=block_b, token_dim=T, mc_block=mc_blk,
                               approximate_gelu=approximate_gelu)

    flops = 4 * B * T * H * (Mt + Mc)
    transcendentals = B * (Mt * H + T * Mc + T)        # both GELUs + rsqrt/row
    bytes_accessed = int(2 * x.size * x_item + weight_bytes)

    def call(single_buffer):
        def weight_spec(arr):
            # Grid-invariant full-array block; single-buffering halves its
            # VMEM footprint (matters on v7x's 64 MiB at real Mixer sizes).
            kwargs = {}
            if single_buffer:
                kwargs["pipeline_mode"] = pl.Buffered(1)
            nd = arr.ndim
            return pl.BlockSpec(arr.shape, lambda i, _n=nd: (0,) * _n, **kwargs)

        vmem_need = _estimate_vmem_bytes(block_b, T, H, Mt, mc_blk, x_item,
                                         out_item, weight_bytes, single_buffer)
        vmem_limit = int(min(0.9 * cap, max(32 * _MIB, 1.5 * vmem_need)))

        return pl.pallas_call(
            kernel,
            out_shape=jax.ShapeDtypeStruct((B * T, H), x.dtype),
            grid_spec=pltpu.PrefetchScalarGridSpec(
                num_scalar_prefetch=0,
                grid=grid,
                in_specs=[pl.BlockSpec((rows, H), lambda i: (i, 0))]
                         + [weight_spec(a) for a in weights],
                out_specs=pl.BlockSpec((rows, H), lambda i: (i, 0)),
                scratch_shapes=[pltpu.VMEM((rows, H), jnp.float32)],
            ),
            compiler_params=pltpu.CompilerParams(
                dimension_semantics=("parallel",),
                vmem_limit_bytes=vmem_limit),
            cost_estimate=pl.CostEstimate(
                flops=flops,
                transcendentals=transcendentals,
                bytes_accessed=bytes_accessed),
        )(x2d, *weights)

    if single_buffer_weights is None:
        # Prefer single-buffered invariant weights; gracefully fall back if
        # this Pallas build rejects buffer_count=1.
        try:
            out2d = call(True)
        except Exception:
            out2d = call(False)
    else:
        out2d = call(bool(single_buffer_weights))

    return out2d.reshape(B, T, H)


def ref_forward(x, params):
    """Pure-JAX reference mirroring the PyTorch forward exactly (f32)."""
    wt1, bt1, wt2, bt2, g2, be2, wc1, bc1, wc2, bc2 = params
    g = _gelu_exact
    # layer_norm_1 result is discarded in the reference module.
    xt = jnp.transpose(x, (0, 2, 1))                               # (B, H, T)
    h = g(xt @ wt1.T + bt1) @ wt2.T + bt2                          # (B, H, T)
    x1 = x + jnp.transpose(h, (0, 2, 1))                           # (B, T, H)
    mean = x1.mean(-1, keepdims=True)
    var = ((x1 - mean) ** 2).mean(-1, keepdims=True)
    y = (x1 - mean) / jnp.sqrt(var + 1e-5) * g2 + be2
    c = g(y @ wc1.T + bc1) @ wc2.T + bc2
    return x1 + c


def make_params(key, hidden_dim, token_dim, token_mlp_dim, channel_mlp_dim):
    """Deterministic parameter init (PyTorch Linear-style uniform bounds)."""
    ks = jax.random.split(key, 8)

    def linear(kw, kb, fan_in, fan_out):
        bound = 1.0 / jnp.sqrt(fan_in)
        w = jax.random.uniform(kw, (fan_out, fan_in), jnp.float32, -bound, bound)
        b = jax.random.uniform(kb, (1, fan_out), jnp.float32, -bound, bound)
        return w, b

    wt1, bt1 = linear(ks[0], ks[1], token_dim, token_mlp_dim)
    wt2, bt2 = linear(ks[2], ks[3], token_mlp_dim, token_dim)
    wc1, bc1 = linear(ks[4], ks[5], hidden_dim, channel_mlp_dim)
    wc2, bc2 = linear(ks[6], ks[7], channel_mlp_dim, hidden_dim)
    g2 = jnp.ones((1, hidden_dim), jnp.float32)      # layer_norm_2 weight
    be2 = jnp.zeros((1, hidden_dim), jnp.float32)    # layer_norm_2 bias
    return (wt1, bt1, wt2, bt2, g2, be2, wc1, bc1, wc2, bc2)


if __name__ == "__main__":
    key = jax.random.PRNGKey(0)

    # ---- Test 1: small shapes, f32 MXU operands, tight check -------------
    B, T, H = 2, 8, 32
    TOKEN_MLP, CHANNEL_MLP = 16, 64
    k_x, k_p, k_x2, k_p2 = jax.random.split(key, 4)
    x = jax.random.normal(k_x, (B, T, H), jnp.float32)
    params = make_params(k_p, H, T, TOKEN_MLP, CHANNEL_MLP)
    expected = ref_forward(x, params)

    out_f32 = jax.block_until_ready(
        mixer_block(x, params, matmul_dtype=jnp.float32))
    assert out_f32.shape == (B, T, H)
    assert jnp.allclose(out_f32, expected, atol=1e-5, rtol=1e-5), (
        float(jnp.max(jnp.abs(out_f32 - expected))))

    # ---- Test 2: default path (bf16 MXU operands, f32 accumulation) ------
    out_bf16 = jax.block_until_ready(mixer_block(x, params))
    assert out_bf16.shape == (B, T, H)
    err = float(jnp.max(jnp.abs(out_bf16.astype(jnp.float32) - expected)))
    scale = float(jnp.max(jnp.abs(expected))) + 1.0
    assert err <= 0.05 * scale, (err, scale)

    # ---- Test 3: exercise the Mc-tiled channel MLP path (fori_loop) ------
    B2, T2, H2 = 2, 8, 128
    TOKEN_MLP2, CHANNEL_MLP2 = 16, 256
    x2 = jax.random.normal(k_x2, (B2, T2, H2), jnp.float32)
    params2 = make_params(k_p2, H2, T2, TOKEN_MLP2, CHANNEL_MLP2)
    expected2 = ref_forward(x2, params2)
    out2 = jax.block_until_ready(
        mixer_block(x2, params2, matmul_dtype=jnp.float32, mc_block=128))
    assert out2.shape == (B2, T2, H2)
    assert jnp.allclose(out2, expected2, atol=1e-4, rtol=1e-4), (
        float(jnp.max(jnp.abs(out2 - expected2))))

    print("KERNEL_OK")
</pallas_src>

<mosaic_0001>
module attributes {stable_mosaic.version = 11 : i64} {
  func.func @mixer_block_kernel(%arg0: i32, %arg1: memref<8x32xf32, #tpu.memory_space<vmem>>, %arg2: memref<16x8xf32, #tpu.memory_space<vmem>>, %arg3: memref<16x1xf32, #tpu.memory_space<vmem>>, %arg4: memref<8x16xf32, #tpu.memory_space<vmem>>, %arg5: memref<8x1xf32, #tpu.memory_space<vmem>>, %arg6: memref<1x32xf32, #tpu.memory_space<vmem>>, %arg7: memref<1x32xf32, #tpu.memory_space<vmem>>, %arg8: memref<32x64xf32, #tpu.memory_space<vmem>>, %arg9: memref<1x64xf32, #tpu.memory_space<vmem>>, %arg10: memref<64x32xf32, #tpu.memory_space<vmem>>, %arg11: memref<1x32xf32, #tpu.memory_space<vmem>>, %arg12: memref<8x32xf32, #tpu.memory_space<vmem>>, %arg13: memref<8x32xf32, #tpu.memory_space<vmem>>) attributes {dimension_semantics = [#tpu.dimension_semantics<parallel>], iteration_bounds = array<i64: 2>, scalar_prefetch = 0 : i64, scratch_operands = 1 : i64, tpu.core_type = #tpu.core_type<tc>, window_params = [{transform_indices = @transform_0, window_bounds = array<i64: 8, 32>}, {pipeline_mode = #tpu.pipeline_mode<synchronous>, transform_indices = @transform_1, window_bounds = array<i64: 16, 8>}, {pipeline_mode = #tpu.pipeline_mode<synchronous>, transform_indices = @transform_2, window_bounds = array<i64: 16, 1>}, {pipeline_mode = #tpu.pipeline_mode<synchronous>, transform_indices = @transform_3, window_bounds = array<i64: 8, 16>}, {pipeline_mode = #tpu.pipeline_mode<synchronous>, transform_indices = @transform_4, window_bounds = array<i64: 8, 1>}, {pipeline_mode = #tpu.pipeline_mode<synchronous>, transform_indices = @transform_5, window_bounds = array<i64: 1, 32>}, {pipeline_mode = #tpu.pipeline_mode<synchronous>, transform_indices = @transform_6, window_bounds = array<i64: 1, 32>}, {pipeline_mode = #tpu.pipeline_mode<synchronous>, transform_indices = @transform_7, window_bounds = array<i64: 32, 64>}, {pipeline_mode = #tpu.pipeline_mode<synchronous>, transform_indices = @transform_8, window_bounds = array<i64: 1, 64>}, {pipeline_mode = #tpu.pipeline_mode<synchronous>, transform_indices = @transform_9, window_bounds = array<i64: 64, 32>}, {pipeline_mode = #tpu.pipeline_mode<synchronous>, transform_indices = @transform_10, window_bounds = array<i64: 1, 32>}, {transform_indices = @transform_11, window_bounds = array<i64: 8, 32>}]} {
    %c0 = arith.constant 0 : index
    %c0_0 = arith.constant 0 : index
    %0 = vector.load %arg2[%c0, %c0_0] : memref<16x8xf32, #tpu.memory_space<vmem>>, vector<16x8xf32>
    %c0_1 = arith.constant 0 : index
    %c0_2 = arith.constant 0 : index
    %1 = vector.load %arg4[%c0_1, %c0_2] : memref<8x16xf32, #tpu.memory_space<vmem>>, vector<8x16xf32>
    %c0_3 = arith.constant 0 : index
    %c0_4 = arith.constant 0 : index
    %2 = vector.load %arg3[%c0_3, %c0_4] : memref<16x1xf32, #tpu.memory_space<vmem>>, vector<16x1xf32>
    %c0_5 = arith.constant 0 : index
    %c0_6 = arith.constant 0 : index
    %3 = vector.load %arg5[%c0_5, %c0_6] : memref<8x1xf32, #tpu.memory_space<vmem>>, vector<8x1xf32>
    %c0_7 = arith.constant 0 : index
    %c0_8 = arith.constant 0 : index
    %4 = vector.load %arg1[%c0_7, %c0_8] : memref<8x32xf32, #tpu.memory_space<vmem>>, vector<8x32xf32>
    %cst = arith.constant dense<0.000000e+00> : vector<16x32xf32>
    %5 = tpu.matmul %0, %4, %cst {dimension_numbers = #tpu.dot_dimension_numbers<[1], [0], [0], [1], [0, 0, 1, 1], [], []>} : vector<16x8xf32>, vector<8x32xf32>, vector<16x32xf32> -> vector<16x32xf32>
    %6 = vector.broadcast %2 : vector<16x1xf32> to vector<16x32xf32>
    %7 = arith.addf %5, %6 : vector<16x32xf32>
    %cst_9 = arith.constant 5.000000e-01 : f32
    %8 = vector.broadcast %cst_9 : f32 to vector<16x32xf32>
    %9 = arith.mulf %8, %7 : vector<16x32xf32>
    %cst_10 = arith.constant 0.707106769 : f32
    %10 = vector.broadcast %cst_10 : f32 to vector<16x32xf32>
    %11 = arith.mulf %7, %10 : vector<16x32xf32>
    %12 = math.erf %11 : vector<16x32xf32>
    %cst_11 = arith.constant 1.000000e+00 : f32
    %13 = vector.broadcast %cst_11 : f32 to vector<16x32xf32>
    %14 = arith.addf %13, %12 : vector<16x32xf32>
    %15 = arith.mulf %9, %14 : vector<16x32xf32>
    %cst_12 = arith.constant dense<0.000000e+00> : vector<8x32xf32>
    %16 = tpu.matmul %1, %15, %cst_12 {dimension_numbers = #tpu.dot_dimension_numbers<[1], [0], [0], [1], [0, 0, 1, 1], [], []>} : vector<8x16xf32>, vector<16x32xf32>, vector<8x32xf32> -> vector<8x32xf32>
    %17 = vector.broadcast %3 : vector<8x1xf32> to vector<8x32xf32>
    %18 = arith.addf %16, %17 : vector<8x32xf32>
    %19 = arith.addf %4, %18 : vector<8x32xf32>
    %c0_13 = arith.constant 0 : index
    %c0_14 = arith.constant 0 : index
    %20 = vector.load %arg13[%c0_13, %c0_14] : memref<8x32xf32, #tpu.memory_space<vmem>>, vector<8x32xf32>
    tpu.vector_store %arg13[%c0_13, %c0_14], %19 {strides = array<i32>} : memref<8x32xf32, #tpu.memory_space<vmem>>, vector<8x32xf32>,
    %c0_15 = arith.constant 0 : index
    %c0_16 = arith.constant 0 : index
    %21 = vector.load %arg13[%c0_15, %c0_16] : memref<8x32xf32, #tpu.memory_space<vmem>>, vector<8x32xf32>
    %cst_17 = arith.constant dense<0.000000e+00> : vector<8xf32>
    %22 = vector.multi_reduction <add>, %21, %cst_17 [1] : vector<8x32xf32> to vector<8xf32>
    %23 = vector.shape_cast %22 : vector<8xf32> to vector<8x1xf32>
    %cst_18 = arith.constant 3.200000e+01 : f32
    %24 = vector.broadcast %cst_18 : f32 to vector<8x1xf32>
    %25 = arith.divf %23, %24 : vector<8x1xf32>
    %26 = vector.broadcast %25 : vector<8x1xf32> to vector<8x32xf32>
    %27 = arith.subf %21, %26 : vector<8x32xf32>
    %28 = arith.mulf %27, %27 : vector<8x32xf32>
    %cst_19 = arith.constant dense<0.000000e+00> : vector<8xf32>
    %29 = vector.multi_reduction <add>, %28, %cst_19 [1] : vector<8x32xf32> to vector<8xf32>
    %30 = vector.shape_cast %29 : vector<8xf32> to vector<8x1xf32>
    %cst_20 = arith.constant 3.200000e+01 : f32
    %31 = vector.broadcast %cst_20 : f32 to vector<8x1xf32>
    %32 = arith.divf %30, %31 : vector<8x1xf32>
    %33 = vector.broadcast %25 : vector<8x1xf32> to vector<8x32xf32>
    %34 = arith.subf %21, %33 : vector<8x32xf32>
    %cst_21 = arith.constant 9.99999974E-6 : f32
    %35 = vector.broadcast %cst_21 : f32 to vector<8x1xf32>
    %36 = arith.addf %32, %35 : vector<8x1xf32>
    %37 = math.rsqrt %36 : vector<8x1xf32>
    %38 = vector.broadcast %37 : vector<8x1xf32> to vector<8x32xf32>
    %39 = arith.mulf %34, %38 : vector<8x32xf32>
    %c0_22 = arith.constant 0 : index
    %c0_23 = arith.constant 0 : index
    %40 = vector.load %arg6[%c0_22, %c0_23] : memref<1x32xf32, #tpu.memory_space<vmem>>, vector<1x32xf32>
    %41 = vector.broadcast %40 : vector<1x32xf32> to vector<8x32xf32>
    %42 = arith.mulf %39, %41 : vector<8x32xf32>
    %c0_24 = arith.constant 0 : index
    %c0_25 = arith.constant 0 : index
    %43 = vector.load %arg7[%c0_24, %c0_25] : memref<1x32xf32, #tpu.memory_space<vmem>>, vector<1x32xf32>
    %44 = vector.broadcast %43 : vector<1x32xf32> to vector<8x32xf32>
    %45 = arith.addf %42, %44 : vector<8x32xf32>
    %c0_26 = arith.constant 0 : index
    %c0_27 = arith.constant 0 : index
    %46 = vector.load %arg11[%c0_26, %c0_27] : memref<1x32xf32, #tpu.memory_space<vmem>>, vector<1x32xf32>
    %47 = vector.broadcast %46 : vector<1x32xf32> to vector<8x32xf32>
    %48 = arith.addf %21, %47 : vector<8x32xf32>
    %c0_28 = arith.constant 0 : index
    %c0_29 = arith.constant 0 : index
    %49 = vector.load %arg8[%c0_28, %c0_29] : memref<32x64xf32, #tpu.memory_space<vmem>>, vector<32x64xf32>
    %cst_30 = arith.constant dense<0.000000e+00> : vector<8x64xf32>
    %50 = tpu.matmul %45, %49, %cst_30 {dimension_numbers = #tpu.dot_dimension_numbers<[1], [0], [0], [1], [0, 0, 1, 1], [], []>} : vector<8x32xf32>, vector<32x64xf32>, vector<8x64xf32> -> vector<8x64xf32>
    %c0_31 = arith.constant 0 : index
    %c0_32 = arith.constant 0 : index
    %51 = vector.load %arg9[%c0_31, %c0_32] : memref<1x64xf32, #tpu.memory_space<vmem>>, vector<1x64xf32>
    %52 = vector.broadcast %51 : vector<1x64xf32> to vector<8x64xf32>
    %53 = arith.addf %50, %52 : vector<8x64xf32>
    %cst_33 = arith.constant 5.000000e-01 : f32
    %54 = vector.broadcast %cst_33 : f32 to vector<8x64xf32>
    %55 = arith.mulf %54, %53 : vector<8x64xf32>
    %cst_34 = arith.constant 0.707106769 : f32
    %56 = vector.broadcast %cst_34 : f32 to vector<8x64xf32>
    %57 = arith.mulf %53, %56 : vector<8x64xf32>
    %58 = math.erf %57 : vector<8x64xf32>
    %cst_35 = arith.constant 1.000000e+00 : f32
    %59 = vector.broadcast %cst_35 : f32 to vector<8x64xf32>
    %60 = arith.addf %59, %58 : vector<8x64xf32>
    %61 = arith.mulf %55, %60 : vector<8x64xf32>
    %c0_36 = arith.constant 0 : index
    %c0_37 = arith.constant 0 : index
    %62 = vector.load %arg10[%c0_36, %c0_37] : memref<64x32xf32, #tpu.memory_space<vmem>>, vector<64x32xf32>
    %cst_38 = arith.constant dense<0.000000e+00> : vector<8x32xf32>
    %63 = tpu.matmul %61, %62, %cst_38 {dimension_numbers = #tpu.dot_dimension_numbers<[1], [0], [0], [1], [0, 0, 1, 1], [], []>} : vector<8x64xf32>, vector<64x32xf32>, vector<8x32xf32> -> vector<8x32xf32>
    %64 = arith.addf %48, %63 : vector<8x32xf32>
    %c0_39 = arith.constant 0 : index
    %c0_40 = arith.constant 0 : index
    %65 = vector.load %arg12[%c0_39, %c0_40] : memref<8x32xf32, #tpu.memory_space<vmem>>, vector<8x32xf32>
    tpu.vector_store %arg12[%c0_39, %c0_40], %64 {strides = array<i32>} : memref<8x32xf32, #tpu.memory_space<vmem>>, vector<8x32xf32>,
    return
  }
  func.func @transform_0(%arg0: i32) -> (i32, i32) {
    %c0_i32 = arith.constant 0 : i32
    %c0_i32_0 = arith.constant 0 : i32
    return %arg0, %c0_i32 : i32, i32
  }
  func.func @transform_1(%arg0: i32) -> (i32, i32) {
    %c0_i32 = arith.constant 0 : i32
    %c0_i32_0 = arith.constant 0 : i32
    %c0_i32_1 = arith.constant 0 : i32
    return %c0_i32, %c0_i32_0 : i32, i32
  }
  func.func @transform_2(%arg0: i32) -> (i32, i32) {
    %c0_i32 = arith.constant 0 : i32
    %c0_i32_0 = arith.constant 0 : i32
    %c0_i32_1 = arith.constant 0 : i32
    return %c0_i32, %c0_i32_0 : i32, i32
  }
  func.func @transform_3(%arg0: i32) -> (i32, i32) {
    %c0_i32 = arith.constant 0 : i32
    %c0_i32_0 = arith.constant 0 : i32
    %c0_i32_1 = arith.constant 0 : i32
    return %c0_i32, %c0_i32_0 : i32, i32
  }
  func.func @transform_4(%arg0: i32) -> (i32, i32) {
    %c0_i32 = arith.constant 0 : i32
    %c0_i32_0 = arith.constant 0 : i32
    %c0_i32_1 = arith.constant 0 : i32
    return %c0_i32, %c0_i32_0 : i32, i32
  }
  func.func @transform_5(%arg0: i32) -> (i32, i32) {
    %c0_i32 = arith.constant 0 : i32
    %c0_i32_0 = arith.constant 0 : i32
    %c0_i32_1 = arith.constant 0 : i32
    return %c0_i32, %c0_i32_0 : i32, i32
  }
  func.func @transform_6(%arg0: i32) -> (i32, i32) {
    %c0_i32 = arith.constant 0 : i32
    %c0_i32_0 = arith.constant 0 : i32
    %c0_i32_1 = arith.constant 0 : i32
    return %c0_i32, %c0_i32_0 : i32, i32
  }
  func.func @transform_7(%arg0: i32) -> (i32, i32) {
    %c0_i32 = arith.constant 0 : i32
    %c0_i32_0 = arith.constant 0 : i32
    %c0_i32_1 = arith.constant 0 : i32
    return %c0_i32, %c0_i32_0 : i32, i32
  }
  func.func @transform_8(%arg0: i32) -> (i32, i32) {
    %c0_i32 = arith.constant 0 : i32
    %c0_i32_0 = arith.constant 0 : i32
    %c0_i32_1 = arith.constant 0 : i32
    return %c0_i32, %c0_i32_0 : i32, i32
  }
  func.func @transform_9(%arg0: i32) -> (i32, i32) {
    %c0_i32 = arith.constant 0 : i32
    %c0_i32_0 = arith.constant 0 : i32
    %c0_i32_1 = arith.constant 0 : i32
    return %c0_i32, %c0_i32_0 : i32, i32
  }
  func.func @transform_10(%arg0: i32) -> (i32, i32) {
    %c0_i32 = arith.constant 0 : i32
    %c0_i32_0 = arith.constant 0 : i32
    %c0_i32_1 = arith.constant 0 : i32
    return %c0_i32, %c0_i32_0 : i32, i32
  }
  func.func @transform_11(%arg0: i32) -> (i32, i32) {
    %c0_i32 = arith.constant 0 : i32
    %c0_i32_0 = arith.constant 0 : i32
    return %arg0, %c0_i32 : i32, i32
  }
}

module attributes {stable_mosaic.version = 11 : i64} {
  func.func @mixer_block_kernel(%arg0: i32, %arg1: memref<8x32xf32, #tpu.memory_space<vmem>>, %arg2: memref<16x8xf32, #tpu.memory_space<vmem>>, %arg3: memref<16x1xf32, #tpu.memory_space<vmem>>, %arg4: memref<8x16xf32, #tpu.memory_space<vmem>>, %arg5: memref<8x1xf32, #tpu.memory_space<vmem>>, %arg6: memref<1x32xf32, #tpu.memory_space<vmem>>, %arg7: memref<1x32xf32, #tpu.memory_space<vmem>>, %arg8: memref<32x64xf32, #tpu.memory_space<vmem>>, %arg9: memref<1x64xf32, #tpu.memory_space<vmem>>, %arg10: memref<64x32xf32, #tpu.memory_space<vmem>>, %arg11: memref<1x32xf32, #tpu.memory_space<vmem>>, %arg12: memref<8x32xf32, #tpu.memory_space<vmem>>, %arg13: memref<8x32xf32, #tpu.memory_space<vmem>>) attributes {dimension_semantics = [#tpu.dimension_semantics<parallel>], iteration_bounds = array<i64: 2>, scalar_prefetch = 0 : i64, scratch_operands = 1 : i64, tpu.core_type = #tpu.core_type<tc>, window_params = [{transform_indices = @transform_0, window_bounds = array<i64: 8, 32>}, {pipeline_mode = #tpu.pipeline_mode<synchronous>, transform_indices = @transform_1, window_bounds = array<i64: 16, 8>}, {pipeline_mode = #tpu.pipeline_mode<synchronous>, transform_indices = @transform_2, window_bounds = array<i64: 16, 1>}, {pipeline_mode = #tpu.pipeline_mode<synchronous>, transform_indices = @transform_3, window_bounds = array<i64: 8, 16>}, {pipeline_mode = #tpu.pipeline_mode<synchronous>, transform_indices = @transform_4, window_bounds = array<i64: 8, 1>}, {pipeline_mode = #tpu.pipeline_mode<synchronous>, transform_indices = @transform_5, window_bounds = array<i64: 1, 32>}, {pipeline_mode = #tpu.pipeline_mode<synchronous>, transform_indices = @transform_6, window_bounds = array<i64: 1, 32>}, {pipeline_mode = #tpu.pipeline_mode<synchronous>, transform_indices = @transform_7, window_bounds = array<i64: 32, 64>}, {pipeline_mode = #tpu.pipeline_mode<synchronous>, transform_indices = @transform_8, window_bounds = array<i64: 1, 64>}, {pipeline_mode = #tpu.pipeline_mode<synchronous>, transform_indices = @transform_9, window_bounds = array<i64: 64, 32>}, {pipeline_mode = #tpu.pipeline_mode<synchronous>, transform_indices = @transform_10, window_bounds = array<i64: 1, 32>}, {transform_indices = @transform_11, window_bounds = array<i64: 8, 32>}]} {
    %c0 = arith.constant 0 : index
    %c0_0 = arith.constant 0 : index
    %0 = vector.load %arg2[%c0, %c0_0] : memref<16x8xf32, #tpu.memory_space<vmem>>, vector<16x8xf32>
    %c0_1 = arith.constant 0 : index
    %c0_2 = arith.constant 0 : index
    %1 = vector.load %arg4[%c0_1, %c0_2] : memref<8x16xf32, #tpu.memory_space<vmem>>, vector<8x16xf32>
    %c0_3 = arith.constant 0 : index
    %c0_4 = arith.constant 0 : index
    %2 = vector.load %arg3[%c0_3, %c0_4] : memref<16x1xf32, #tpu.memory_space<vmem>>, vector<16x1xf32>
    %c0_5 = arith.constant 0 : index
    %c0_6 = arith.constant 0 : index
    %3 = vector.load %arg5[%c0_5, %c0_6] : memref<8x1xf32, #tpu.memory_space<vmem>>, vector<8x1xf32>
    %c0_7 = arith.constant 0 : index
    %c0_8 = arith.constant 0 : index
    %4 = vector.load %arg1[%c0_7, %c0_8] : memref<8x32xf32, #tpu.memory_space<vmem>>, vector<8x32xf32>
    %cst = arith.constant dense<0.000000e+00> : vector<16x32xf32>
    %5 = tpu.matmul %0, %4, %cst {dimension_numbers = #tpu.dot_dimension_numbers<[1], [0], [0], [1], [0, 0, 1, 1], [], []>} : vector<16x8xf32>, vector<8x32xf32>, vector<16x32xf32> -> vector<16x32xf32>
    %6 = vector.broadcast %2 : vector<16x1xf32> to vector<16x32xf32>
    %7 = arith.addf %5, %6 : vector<16x32xf32>
    %cst_9 = arith.constant 5.000000e-01 : f32
    %8 = vector.broadcast %cst_9 : f32 to vector<16x32xf32>
    %9 = arith.mulf %8, %7 : vector<16x32xf32>
    %cst_10 = arith.constant 0.707106769 : f32
    %10 = vector.broadcast %cst_10 : f32 to vector<16x32xf32>
    %11 = arith.mulf %7, %10 : vector<16x32xf32>
    %12 = math.erf %11 : vector<16x32xf32>
    %cst_11 = arith.constant 1.000000e+00 : f32
    %13 = vector.broadcast %cst_11 : f32 to vector<16x32xf32>
    %14 = arith.addf %13, %12 : vector<16x32xf32>
    %15 = arith.mulf %9, %14 : vector<16x32xf32>
    %cst_12 = arith.constant dense<0.000000e+00> : vector<8x32xf32>
    %16 = tpu.matmul %1, %15, %cst_12 {dimension_numbers = #tpu.dot_dimension_numbers<[1], [0], [0], [1], [0, 0, 1, 1], [], []>} : vector<8x16xf32>, vector<16x32xf32>, vector<8x32xf32> -> vector<8x32xf32>
    %17 = vector.broadcast %3 : vector<8x1xf32> to vector<8x32xf32>
    %18 = arith.addf %16, %17 : vector<8x32xf32>
    %19 = arith.addf %4, %18 : vector<8x32xf32>
    %c0_13 = arith.constant 0 : index
    %c0_14 = arith.constant 0 : index
    %20 = vector.load %arg13[%c0_13, %c0_14] : memref<8x32xf32, #tpu.memory_space<vmem>>, vector<8x32xf32>
    tpu.vector_store %arg13[%c0_13, %c0_14], %19 {strides = array<i32>} : memref<8x32xf32, #tpu.memory_space<vmem>>, vector<8x32xf32>,
    %c0_15 = arith.constant 0 : index
    %c0_16 = arith.constant 0 : index
    %21 = vector.load %arg13[%c0_15, %c0_16] : memref<8x32xf32, #tpu.memory_space<vmem>>, vector<8x32xf32>
    %cst_17 = arith.constant dense<0.000000e+00> : vector<8xf32>
    %22 = vector.multi_reduction <add>, %21, %cst_17 [1] : vector<8x32xf32> to vector<8xf32>
    %23 = vector.shape_cast %22 : vector<8xf32> to vector<8x1xf32>
    %cst_18 = arith.constant 3.200000e+01 : f32
    %24 = vector.broadcast %cst_18 : f32 to vector<8x1xf32>
    %25 = arith.divf %23, %24 : vector<8x1xf32>
    %26 = vector.broadcast %25 : vector<8x1xf32> to vector<8x32xf32>
    %27 = arith.subf %21, %26 : vector<8x32xf32>
    %28 = arith.mulf %27, %27 : vector<8x32xf32>
    %cst_19 = arith.constant dense<0.000000e+00> : vector<8xf32>
    %29 = vector.multi_reduction <add>, %28, %cst_19 [1] : vector<8x32xf32> to vector<8xf32>
    %30 = vector.shape_cast %29 : vector<8xf32> to vector<8x1xf32>
    %cst_20 = arith.constant 3.200000e+01 : f32
    %31 = vector.broadcast %cst_20 : f32 to vector<8x1xf32>
    %32 = arith.divf %30, %31 : vector<8x1xf32>
    %33 = vector.broadcast %25 : vector<8x1xf32> to vector<8x32xf32>
    %34 = arith.subf %21, %33 : vector<8x32xf32>
    %cst_21 = arith.constant 9.99999974E-6 : f32
    %35 = vector.broadcast %cst_21 : f32 to vector<8x1xf32>
    %36 = arith.addf %32, %35 : vector<8x1xf32>
    %37 = math.rsqrt %36 : vector<8x1xf32>
    %38 = vector.broadcast %37 : vector<8x1xf32> to vector<8x32xf32>
    %39 = arith.mulf %34, %38 : vector<8x32xf32>
    %c0_22 = arith.constant 0 : index
    %c0_23 = arith.constant 0 : index
    %40 = vector.load %arg6[%c0_22, %c0_23] : memref<1x32xf32, #tpu.memory_space<vmem>>, vector<1x32xf32>
    %41 = vector.broadcast %40 : vector<1x32xf32> to vector<8x32xf32>
    %42 = arith.mulf %39, %41 : vector<8x32xf32>
    %c0_24 = arith.constant 0 : index
    %c0_25 = arith.constant 0 : index
    %43 = vector.load %arg7[%c0_24, %c0_25] : memref<1x32xf32, #tpu.memory_space<vmem>>, vector<1x32xf32>
    %44 = vector.broadcast %43 : vector<1x32xf32> to vector<8x32xf32>
    %45 = arith.addf %42, %44 : vector<8x32xf32>
    %c0_26 = arith.constant 0 : index
    %c0_27 = arith.constant 0 : index
    %46 = vector.load %arg11[%c0_26, %c0_27] : memref<1x32xf32, #tpu.memory_space<vmem>>, vector<1x32xf32>
    %47 = vector.broadcast %46 : vector<1x32xf32> to vector<8x32xf32>
    %48 = arith.addf %21, %47 : vector<8x32xf32>
    %c0_28 = arith.constant 0 : index
    %c0_29 = arith.constant 0 : index
    %49 = vector.load %arg8[%c0_28, %c0_29] : memref<32x64xf32, #tpu.memory_space<vmem>>, vector<32x64xf32>
    %cst_30 = arith.constant dense<0.000000e+00> : vector<8x64xf32>
    %50 = tpu.matmul %45, %49, %cst_30 {dimension_numbers = #tpu.dot_dimension_numbers<[1], [0], [0], [1], [0, 0, 1, 1], [], []>} : vector<8x32xf32>, vector<32x64xf32>, vector<8x64xf32> -> vector<8x64xf32>
    %c0_31 = arith.constant 0 : index
    %c0_32 = arith.constant 0 : index
    %51 = vector.load %arg9[%c0_31, %c0_32] : memref<1x64xf32, #tpu.memory_space<vmem>>, vector<1x64xf32>
    %52 = vector.broadcast %51 : vector<1x64xf32> to vector<8x64xf32>
    %53 = arith.addf %50, %52 : vector<8x64xf32>
    %cst_33 = arith.constant 5.000000e-01 : f32
    %54 = vector.broadcast %cst_33 : f32 to vector<8x64xf32>
    %55 = arith.mulf %54, %53 : vector<8x64xf32>
    %cst_34 = arith.constant 0.707106769 : f32
    %56 = vector.broadcast %cst_34 : f32 to vector<8x64xf32>
    %57 = arith.mulf %53, %56 : vector<8x64xf32>
    %58 = math.erf %57 : vector<8x64xf32>
    %cst_35 = arith.constant 1.000000e+00 : f32
    %59 = vector.broadcast %cst_35 : f32 to vector<8x64xf32>
    %60 = arith.addf %59, %58 : vector<8x64xf32>
    %61 = arith.mulf %55, %60 : vector<8x64xf32>
    %c0_36 = arith.constant 0 : index
    %c0_37 = arith.constant 0 : index
    %62 = vector.load %arg10[%c0_36, %c0_37] : memref<64x32xf32, #tpu.memory_space<vmem>>, vector<64x32xf32>
    %cst_38 = arith.constant dense<0.000000e+00> : vector<8x32xf32>
    %63 = tpu.matmul %61, %62, %cst_38 {dimension_numbers = #tpu.dot_dimension_numbers<[1], [0], [0], [1], [0, 0, 1, 1], [], []>} : vector<8x64xf32>, vector<64x32xf32>, vector<8x32xf32> -> vector<8x32xf32>
    %64 = arith.addf %48, %63 : vector<8x32xf32>
    %c0_39 = arith.constant 0 : index
    %c0_40 = arith.constant 0 : index
    %65 = vector.load %arg12[%c0_39, %c0_40] : memref<8x32xf32, #tpu.memory_space<vmem>>, vector<8x32xf32>
    tpu.vector_store %arg12[%c0_39, %c0_40], %64 {strides = array<i32>} : memref<8x32xf32, #tpu.memory_space<vmem>>, vector<8x32xf32>,
    return
  }
  func.func @transform_0(%arg0: i32) -> (i32, i32) {
    %c0_i32 = arith.constant 0 : i32
    %c0_i32_0 = arith.constant 0 : i32
    return %arg0, %c0_i32 : i32, i32
  }
  func.func @transform_1(%arg0: i32) -> (i32, i32) {
    %c0_i32 = arith.constant 0 : i32
    %c0_i32_0 = arith.constant 0 : i32
    %c0_i32_1 = arith.constant 0 : i32
    return %c0_i32, %c0_i32_0 : i32, i32
  }
  func.func @transform_2(%arg0: i32) -> (i32, i32) {
    %c0_i32 = arith.constant 0 : i32
    %c0_i32_0 = arith.constant 0 : i32
    %c0_i32_1 = arith.constant 0 : i32
    return %c0_i32, %c0_i32_0 : i32, i32
  }
  func.func @transform_3(%arg0: i32) -> (i32, i32) {
    %c0_i32 = arith.constant 0 : i32
    %c0_i32_0 = arith.constant 0 : i32
    %c0_i32_1 = arith.constant 0 : i32
    return %c0_i32, %c0_i32_0 : i32, i32
  }
  func.func @transform_4(%arg0: i32) -> (i32, i32) {
    %c0_i32 = arith.constant 0 : i32
    %c0_i32_0 = arith.constant 0 : i32
    %c0_i32_1 = arith.constant 0 : i32
    return %c0_i32, %c0_i32_0 : i32, i32
  }
  func.func @transform_5(%arg0: i32) -> (i32, i32) {
    %c0_i32 = arith.constant 0 : i32
    %c0_i32_0 = arith.constant 0 : i32
    %c0_i32_1 = arith.constant 0 : i32
    return %c0_i32, %c0_i32_0 : i32, i32
  }
  func.func @transform_6(%arg0: i32) -> (i32, i32) {
    %c0_i32 = arith.constant 0 : i32
    %c0_i32_0 = arith.constant 0 : i32
    %c0_i32_1 = arith.constant 0 : i32
    return %c0_i32, %c0_i32_0 : i32, i32
  }
  func.func @transform_7(%arg0: i32) -> (i32, i32) {
    %c0_i32 = arith.constant 0 : i32
    %c0_i32_0 = arith.constant 0 : i32
    %c0_i32_1 = arith.constant 0 : i32
    return %c0_i32, %c0_i32_0 : i32, i32
  }
  func.func @transform_8(%arg0: i32) -> (i32, i32) {
    %c0_i32 = arith.constant 0 : i32
    %c0_i32_0 = arith.constant 0 : i32
    %c0_i32_1 = arith.constant 0 : i32
    return %c0_i32, %c0_i32_0 : i32, i32
  }
  func.func @transform_9(%arg0: i32) -> (i32, i32) {
    %c0_i32 = arith.constant 0 : i32
    %c0_i32_0 = arith.constant 0 : i32
    %c0_i32_1 = arith.constant 0 : i32
    return %c0_i32, %c0_i32_0 : i32, i32
  }
  func.func @transform_10(%arg0: i32) -> (i32, i32) {
    %c0_i32 = arith.constant 0 : i32
    %c0_i32_0 = arith.constant 0 : i32
    %c0_i32_1 = arith.constant 0 : i32
    return %c0_i32, %c0_i32_0 : i32, i32
  }
  func.func @transform_11(%arg0: i32) -> (i32, i32) {
    %c0_i32 = arith.constant 0 : i32
    %c0_i32_0 = arith.constant 0 : i32
    return %arg0, %c0_i32 : i32, i32
  }
}

</mosaic_0001>

<bundles_post_ra>
// kernel: tpu_custom_call.1
= control target key start
LH: loop header
LB: loop body
LE: loop exit
PB: predicated region body
PF: predicated region fallthrough
CT: control target
= control target key end

     0   :  { %s1308_s0 = inlined_call_operand.vmem [shape: f32[16,32], index: 0, kind: input, shape index: {}]   ;;  %s1309_s1 = inlined_call_operand.vmem [shape: f32[16,8], index: 1, kind: input, shape index: {}]   ;;  %s1310_s2 = inlined_call_operand.vmem [shape: f32[16,1], index: 2, kind: input, shape index: {}]   ;;  %s1311_s3 = inlined_call_operand.vmem [shape: f32[8,16], index: 3, kind: input, shape index: {}]   ;;  %s1312_s4 = inlined_call_operand.vmem [shape: f32[8,1], index: 4, kind: input, shape index: {}]   ;;  %s1313_s5 = inlined_call_operand.vmem [shape: f32[1,32], index: 5, kind: input, shape index: {}]   ;;  %s1314_s6 = inlined_call_operand.vmem [shape: f32[1,32], index: 6, kind: input, shape index: {}]   ;;  %s1315_s7 = inlined_call_operand.vmem [shape: f32[32,64], index: 7, kind: input, shape index: {}]   ;;  %s1316_s8 = inlined_call_operand.vmem [shape: f32[1,64], index: 8, kind: input, shape index: {}]   ;;  %s1317_s9 = inlined_call_operand.vmem [shape: f32[64,32], index: 9, kind: input, shape index: {}]   ;;  %s1318_s10 = inlined_call_operand.vmem [shape: f32[1,32], index: 10, kind: input, shape index: {}]   ;;  %s1319_s11 = inlined_call_operand.hbm [shape: f32[16,32], index: 11, kind: output, shape index: {}]  }
   0x1   :  { %1320 = sst [smem:[#allocation6_spill]] %s1308_s0 }
   0x2   :  { %1321 = sst [smem:[#allocation7_spill]] %s1309_s1 }
   0x3   :  { %16 = vsyncpa [#allocation4], 0 }
   0x4   :  { %18 = vsyncpa [#allocation4 + $0x1], 0  ;;  %s1117_s17 = smov 0   ;;  %s1119_s18 = smov 0  }
   0x5   :  { %s1121_s19 = smov 0   ;;  %s1123_s20 = smov 0  }
   0x6 LB: > { %s1138_s21 = sadd.s32 4294967295, %s1051_s20   ;;  %s858_s22 = sadd.s32 4294967294, %s1051_s20   ;;  %s1051_s20 = sphi %s1123_s20, %s1329_s20   ;;  %s1047_s19 = sphi %s1121_s19, %s1328_s19   ;;  %s1043_s18 = sphi %s1119_s18, %s1327_s18   ;;  %s1039_s17 = sphi %s1117_s17, %s1326_s17  }
   0x7   : > { %s1142_s23 = sadd.s32 1, %s1051_s20   ;;  %s267_s24 = sadd.s32 1, %s1047_s19 }
   0x8   : > { %s264_s25 = ssub.s32 %s1051_s20, %s1142_s23  ;;  %p277_p0 = scmp.ne.s32.totalorder %s1047_s19, %s1043_s18 }
   0x9   : > { %p265_p1 = scmp.eq.s32.totalorder %s264_s25, 0  ;;  %p278_p2 = scmp.eq.s32.totalorder %s1138_s21, 1 }
   0xa   : > { %p283_p3 = scmp.ne.s32.totalorder %s1043_s18, %s1039_s17  ;;  %p284_p4 = scmp.eq.s32.totalorder %s858_s22, 1 }
   0xb   : > { %s1153_s26 = scalar_select %p265_p1, %s1047_s19, %s267_s24  }
   0xc   : > { %p1155_p5 = por %p278_p2, %p277_p0  ;;  %p1159_p6 = por %p284_p4, %p283_p3 }
   0xd   : > { %p861_p7 = scmp.ge.s32.totalorder %s1051_s20, 1  ;;  %p339_p8 = scmp.lt.s32.totalorder %s1051_s20, 3 }
   0xf   : > { %p340_p9 = pnand %p861_p7, %p339_p8 }
  0x10   : > { %p378_p10 = scmp.lt.s32.totalorder (!%p340_p9), %s1138_s21, 1  ;;  %s1324_s1 = sld [smem:[#allocation7_spill]] (!%p340_p9) }
  0x11   : > { %343 = sbr.rel (%p340_p9) target bundleno = 1183 (0x49f), region = 64  ;;  %s1325_s0 = sld [smem:[#allocation6_spill]] (!%p340_p9) }
  0x12   : > { %s874_s30 = sshll.u32 (!%p340_p9), %s1138_s21, 7 }
  0x13   : > { %s1272_s16 = scalar_lea.hbm (!%p340_p9), %s1319_s11, %s874_s30 }
  0x16   : > { %v382_v0 = vld [vmem:[%s1324_s1] sm:$0xff]  ;;  %vm399_vm0 = vcmask 64512   ;;  %v386_v1 = vld [vmem:[%s1310_s2 + $0x8] sm:$0xff]  ;;  %v1053_v2 = vmov 0   ;;  %s379_s14 = scalar_select %p378_p10, %s1138_s21, 1  ;;  %v1054_v6 = vmov 0.0  }
  0x17   : > { %899 = vmatprep.mubr.msk.f32.mxu0 %vm399_vm0, %v382_v0  ;;  %981 = vset.pattern.permute.xlu0 %v1053_v2  ;;  %v385_v3 = vld [vmem:[%s1310_s2] sm:$0xff]  ;;  %v383_v5 = vld [vmem:[%s1324_s1 + $0x8] sm:$0xff]  ;;  %vm1055_vm1 = vmmov 0   ;;  %vm496_vm2 = vcmask 130048   ;;  %vm571_vm3 = vcmask 261120   ;;  %v615_v37 = vld [vmem:[%s1315_s7 + $0x18] sm:$0xff] }
  0x18   : > { %396 = vperm.xlu0 %981, %v386_v1   ;;  %982 = vset.pattern.permute.xlu1 %v1053_v2  ;;  %s863_s22 = sshll.u32 %s379_s14, 3  ;;  %v387_v7 = vld [vmem:[%s1312_s4] sm:$0xff]  ;;  %v614_v38 = vld [vmem:[%s1315_s7 + $0x10] sm:$0xff]  ;;  %v613_v39 = vld [vmem:[%s1315_s7 + $0x8] sm:$0xff]  ;;  %vm709_vm4 = vcmask 523264   ;;  %s1056_s21 = smov [#allocation3]  }
  0x19   : > { %s381_s29 = scalar_lea.vmem %s1325_s0, %s863_s22  ;;  %920 = vmatprep.subr.mxu1 %v1054_v6  ;;  %936 = vmatprep.mubr.msk.f32.mxu1 %vm1055_vm1, %v1054_v6  ;;  %v384_v24 = vld [vmem:[%s1311_s3] sm:$0xff]  ;;  %v708_v50 = vld [vmem:[%s1317_s9 + $0x38] sm:$0xff]  ;;  %v707_v51 = vld [vmem:[%s1317_s9 + $0x30] sm:$0xff]  ;;  %s375_s22 = sand.u32 1, %s1043_s18  }
  0x1a   : > { %v388_v4 = vld [vmem:[%s381_s29] sm:$0xff]  ;;  %493 = vperm.xlu1 %982, %v387_v7   ;;  %921 = vmatpush3.msra.mxu1 %v708_v50  ;;  %v706_v52 = vld [vmem:[%s1317_s9 + $0x28] sm:$0xff]  ;;  %v704_v54 = vld [vmem:[%s1317_s9 + $0x18] sm:$0xff]  ;;  %s862_s24 = sshll.u32 %s375_s22, 3  ;;  %s786_s0 = scalar_lea.sflag [#allocation4], %s375_s22 }
  0x1b   : > { %897 = vmatprep.subr.mxu0 %v388_v4  ;;  %v612_v40 = vld [vmem:[%s1315_s7] sm:$0xff]  ;;  %922 = vmatprep.subr.mxu1 %v1054_v6  ;;  %v703_v55 = vld [vmem:[%s1317_s9 + $0x10] sm:$0xff]  ;;  %v702_v56 = vld [vmem:[%s1317_s9 + $0x8] sm:$0xff]  ;;  %s377_s12 = scalar_lea.vmem [#allocation3], %s862_s24  ;;  %s995_s24 = sshll.u32 %s1056_s21, 4  ;;  %s996_s24 = int_to_ptr.vmem [resolvable:$false] %s995_s24 }
  0x1c   : > { %391 = vperm.xlu0 %981, %v385_v3   ;;  %898 = vmatpush3.msra.mxu0 %v388_v4  ;;  %v867_v45 = vld [vmem:[%s1313_s5] ss:$0 sm:$0xff]  ;;  %s799_s13 = sshll.u32 %s377_s12, 4  ;;  %s997_s25 = scalar_lea.vmem %s996_s24, 256  ;;  %s800_s13 = int_to_ptr.vmem [resolvable:$true] %s799_s13 }
  0x1d   : > { %900 = vmatmul.mubr.msk.f32.vlgmr.msra.gmra.mxu0 %vm399_vm0, %v383_v5  ;;  %902 = vmatprep.subr.mxu0 %v1054_v6  ;;  %v868_v47 = vld [vmem:[%s1314_s6] ss:$0 sm:$0xff]  ;;  %s991_s1 = scalar_lea.vmem %s800_s13, 128  ;;  %p998_p0 = scmp.lt.s32.totalorder %s800_s13, %s996_s24 }
  0x1e   : > { %906 = vmatprep.mubr.msk.f32.mxu0 %vm1055_vm1, %v1054_v6  ;;  %923 = vmatpush3.msra.mxu1 %v707_v51  ;;  %v705_v53 = vld [vmem:[%s1317_s9 + $0x20] sm:$0xff]  ;;  %p992_p11 = scmp.ne.s32.totalorder %s800_s13, %s991_s1  ;;  %p999_p1 = scmp.lt.s32.totalorder %s997_s25, %s991_s1 }
  0x1f   : > { %924 = vmatprep.subr.mxu1 %v1054_v6  ;;  %v701_v57 = vld [vmem:[%s1317_s9] sm:$0xff] }
  0x20   : > { %925 = vmatpush3.msra.mxu1 %v706_v52  ;;  %v870_v58 = vld [vmem:[%s1316_s8] ss:$0 sm:$0xff]  ;;  %p993_p12 = pnand %p992_p11, %p1155_p5  ;;  %p1000_p2 = por %p999_p1, %p998_p0 }
  0x21   : > { %926 = vmatprep.subr.mxu1 %v1054_v6  ;;  %v869_v3 = vld [vmem:[%s1318_s10] ss:$0 sm:$0xff] }
  0x22   : > { %927 = vmatpush3.msra.mxu1 %v705_v53  ;;  %p994_p13 = pneg %p993_p12 }
  0x23   : > { %928 = vmatprep.subr.mxu1 %v1054_v6 }
  0x24   : > { %929 = vmatpush3.msra.mxu1 %v704_v54  ;;  %p1001_p3 = pnand %p1000_p2, %p994_p13 }
  0x25   : > { %930 = vmatprep.subr.mxu1 %v1054_v6 }
  0x26   : > { %931 = vmatpush3.msra.mxu1 %v703_v55 }
  0x27   : > { %932 = vmatprep.subr.mxu1 %v1054_v6 }
  0x28   : > { %933 = vmatpush3.msra.mxu1 %v702_v56 }
  0x29   : > { %934 = vmatprep.subr.mxu1 %v1054_v6 }
  0x2a   : > { %935 = vmatpush3.msra.mxu1 %v701_v57 }
  0x93   : > { %v397_v8 = vpop.permute.xlu0 %396 }
  0x95   : > { %v494_v25 = vpop.permute.xlu1 %493 }
  0x97   : > { %v392_v11 = vpop.permute.xlu0 %391 }
  0xdd   : > { %v901_v9 = vpop.f32.mrf.mxu0 }
  0xde   : > { %v478_v10 = vadd.f32 %v901_v9, %v397_v8 }
  0xdf   : > { %v472_v12 = vpop.f32.mrf.mxu0 }
  0xe0   : > { %v484_v13 = vmul.f32 0.70710677, %v478_v10  ;;  %v473_v14 = vadd.f32 %v472_v12, %v392_v11  ;;  %v482_v17 = vmul.f32 0.5, %v478_v10 }
  0xe2   : > { %983 = verf.f32 %v484_v13  ;;  %v483_v15 = vmul.f32 0.70710677, %v473_v14  ;;  %v481_v21 = vmul.f32 0.5, %v473_v14 }
  0xe4   : > { %985 = verf.f32 %v483_v15 }
  0xef   : > { %v984_v16 = vpop.eup %983 }
  0xf0   : > { %v488_v18 = vadd.f32 1.0, %v984_v16 }
  0xf1   : > { %v986_v19 = vpop.eup %985 }
  0xf2   : > { %v490_v20 = vmul.f32 %v488_v18, %v482_v17  ;;  %v487_v22 = vadd.f32 1.0, %v986_v19 }
  0xf4   : > { %v489_v23 = vmul.f32 %v487_v22, %v481_v21  ;;  %903 = vmatpush3.msra.mxu0 %v490_v20 }
  0xf5   : > { %904 = vmatprep.subr.mxu0 %v1054_v6 }
  0xf6   : > { %905 = vmatpush3.msra.mxu0 %v489_v23 }
  0xf7   : > { %907 = vmatmul.mubr.msk.f32.vlgmr.msra.gmra.mxu0 %vm496_vm2, %v384_v24  ;;  %909 = vmatprep.subr.mxu0 %v1054_v6 }
  0xf8   : > { %917 = vmatprep.mubr.msk.f32.mxu0 %vm1055_vm1, %v1054_v6  ;;  %910 = vmatpush3.msra.mxu0 %v615_v37 }
  0xf9   : > { %911 = vmatprep.subr.mxu0 %v1054_v6 }
  0xfa   : > { %912 = vmatpush3.msra.mxu0 %v614_v38 }
  0xfb   : > { %913 = vmatprep.subr.mxu0 %v1054_v6 }
  0xfc   : > { %914 = vmatpush3.msra.mxu0 %v613_v39 }
  0xfd   : > { %915 = vmatprep.subr.mxu0 %v1054_v6 }
  0xfe   : > { %916 = vmatpush3.msra.mxu0 %v612_v40 }
 0x1b7   : > { %v566_v26 = vpop.f32.mrf.mxu0 }
 0x1b8   : > { %v567_v27 = vadd.f32 %v566_v26, %v494_v25 }
 0x1b9   : > { %v908_v28 = vpop.f32.mrf.mxu0 }
 0x1ba   : > { %v570_v29 = vadd.f32 %v567_v27, %v388_v4 }
 0x1bc   : > { %572 = vst.msk [vmem:[#allocation2] sm:$0xff] %vm571_vm3, %v570_v29 }
 0x1c3   : > { %v1201_v30 = vld [vmem:[#allocation2] sm:$0xff] }
 0x1c4   : > { %v574_v31 = vsel %vm571_vm3, %v1201_v30, 0.0  ;;  %v611_v4 = vadd.f32 %v869_v3, %v1201_v30 }
 0x1c5   : > { %575 = vadd.xlane.f32.xlu1 %v574_v31 }
 0x24e   : > { %v576_v32 = vpop.xlane.xlu1 %575 }
 0x24f   : > { %v578_v33 = vmul.f32 0.03125, %v576_v32 }
 0x251   : > { %v579_v34 = vsub.f32 %v1201_v30, %v578_v33 }
 0x253   : > { %v580_v35 = vmul.f32 %v579_v34, %v579_v34 }
 0x255   : > { %v581_v36 = vsel %vm571_vm3, %v580_v35, 0.0 }
 0x256   : > { %582 = vadd.xlane.f32.xlu0 %v581_v36 }
 0x2df   : > { %v583_v41 = vpop.xlane.xlu0 %582 }
 0x2e0   : > { %v584_v42 = vmul.f32 0.03125, %v583_v41 }
 0x2e2   : > { %v585_v43 = vadd.f32 1e-05, %v584_v42 }
 0x2e4   : > { %987 = vrsqrt.f32 %v585_v43 }
 0x2f1   : > { %v988_v44 = vpop.eup %987 }
 0x2f2   : > { %v587_v46 = vmul.f32 %v988_v44, %v579_v34 }
 0x2f4   : > { %v595_v48 = vmul.f32 %v867_v45, %v587_v46 }
 0x2f6   : > { %v603_v49 = vadd.f32 %v868_v47, %v595_v48 }
 0x2f8   : > { %918 = vmatmul.mubr.msk.f32.vlgmr.msra.gmra.mxu0 %vm571_vm3, %v603_v49 }
 0x3b8   : > { %v692_v59 = vpop.f32.mrf.mxu0 }
 0x3b9   : > { %v693_v60 = vadd.f32 %v870_v58, %v692_v59 }
 0x3ba   : > { %v919_v61 = vpop.f32.mrf.mxu0 }
 0x3bb   : > { %v697_v62 = vmul.f32 0.70710677, %v693_v60  ;;  %v696_v0 = vmul.f32 0.5, %v693_v60 }
 0x3bd   : > { %989 = verf.f32 %v697_v62 }
 0x3ca   : > { %v990_v63 = vpop.eup %989 }
 0x3cb   : > { %v699_v1 = vadd.f32 1.0, %v990_v63 }
 0x3cd   : > { %v700_v2 = vmul.f32 %v699_v1, %v696_v0 }
 0x3cf   : > { %937 = vmatmul.mubr.msk.f32.vlgmr.msra.gmra.mxu1 %vm709_vm4, %v700_v2 }
 0x48f   : > { %v779_v5 = vpop.f32.mrf.mxu1 }
 0x490   : > { %v783_v6 = vadd.f32 %v779_v5, %v611_v4 }
 0x491   : > { %v938_v7 = vpop.f32.mrf.mxu1 }
 0x492   : > { %784 = vst.msk [vmem:[%s377_s12] sm:$0xff] %vm571_vm3, %v783_v6 }
 0x493   : > { %1004 = shalt.err (!%p1001_p3)
}
 0x494   : > { %s1005_s29 = scalar_lea.hbm %s1272_s16, 128  ;;  %s1009_s12 = scalar_lea.hbm %s1319_s11, 256 }
 0x495   : > { %p1006_p4 = scmp.ne.s32.totalorder %s1272_s16, %s1005_s29  ;;  %p1010_p9 = scmp.lt.s32.totalorder %s1272_s16, %s1319_s11 }
 0x496   : > { %p1011_p10 = scmp.lt.s32.totalorder %s1009_s12, %s1005_s29 }
 0x497   : > { %p1007_p7 = pnand %p1006_p4, %p1155_p5 }
 0x498   : > { %p1012_p11 = por %p1011_p10, %p1010_p9 }
 0x499   : > { %p1008_p8 = pneg %p1007_p7 }
 0x49b   : > { %p1013_p12 = pnand %p1012_p11, %p1008_p8 }
 0x49d   : > { %1016 = shalt.err (!%p1013_p12)
}
 0x49e   : > { %939 = dma.vmem_to_hbm [thread:$0]  (%p1155_p5), %s800_s13, 128, %s1272_s16, %s786_s0  }
 0x49f PF: > { %p945_p13 = scmp.ge.s32.totalorder %s1051_s20, 2  ;;  %s811_s1 = sand.u32 1, %s1039_s17  }
 0x4a0   : > { %s812_s21 = scalar_lea.sflag [#allocation4], %s811_s1 }
 0x4a1   : > { %p942_p0 = pnand %p945_p13, %p1159_p6 }
 0x4a3   : > { %p943_p1 = pneg %p942_p0 }
 0x4a5   : > { %1034 = dma.done.wait (%p943_p1), %s812_s21, 128  }
 0x4a6   : > { %1036 = vsyncadd (%p943_p1), %s812_s21, 4294967168  ;;  %p21_p2 = scmp.ge.s32.totalorder %s1142_s23, 4   ;;  %s1326_s17 = smov %s1043_s18 }
 0x4a7   : > { %s1327_s18 = smov %s1047_s19  ;;  %s1328_s19 = smov %s1153_s26 }
 0x4a8   : > { %s1329_s20 = smov %s1142_s23  ;;  %23 = sbr.rel (!%p21_p2) target bundleno = 6 (0x6), region = 99 }
 0x4ad   :  { %817 = vsyncpa [#allocation4], 1 }
 0x4ae   :  { %819 = vsyncpa [#allocation4 + $0x1], 1 }

// kernel: tpu_custom_call.1
= control target key start
LH: loop header
LB: loop body
LE: loop exit
PB: predicated region body
PF: predicated region fallthrough
CT: control target
= control target key end

     0   :  { %s1308_s0 = inlined_call_operand.vmem [shape: f32[16,32], index: 0, kind: input, shape index: {}]   ;;  %s1309_s1 = inlined_call_operand.vmem [shape: f32[16,8], index: 1, kind: input, shape index: {}]   ;;  %s1310_s2 = inlined_call_operand.vmem [shape: f32[16,1], index: 2, kind: input, shape index: {}]   ;;  %s1311_s3 = inlined_call_operand.vmem [shape: f32[8,16], index: 3, kind: input, shape index: {}]   ;;  %s1312_s4 = inlined_call_operand.vmem [shape: f32[8,1], index: 4, kind: input, shape index: {}]   ;;  %s1313_s5 = inlined_call_operand.vmem [shape: f32[1,32], index: 5, kind: input, shape index: {}]   ;;  %s1314_s6 = inlined_call_operand.vmem [shape: f32[1,32], index: 6, kind: input, shape index: {}]   ;;  %s1315_s7 = inlined_call_operand.vmem [shape: f32[32,64], index: 7, kind: input, shape index: {}]   ;;  %s1316_s8 = inlined_call_operand.vmem [shape: f32[1,64], index: 8, kind: input, shape index: {}]   ;;  %s1317_s9 = inlined_call_operand.vmem [shape: f32[64,32], index: 9, kind: input, shape index: {}]   ;;  %s1318_s10 = inlined_call_operand.vmem [shape: f32[1,32], index: 10, kind: input, shape index: {}]   ;;  %s1319_s11 = inlined_call_operand.hbm [shape: f32[16,32], index: 11, kind: output, shape index: {}]  }
   0x1   :  { %1320 = sst [smem:[#allocation6_spill]] %s1308_s0 }
   0x2   :  { %1321 = sst [smem:[#allocation7_spill]] %s1309_s1 }
   0x3   :  { %16 = vsyncpa [#allocation4], 0 }
   0x4   :  { %18 = vsyncpa [#allocation4 + $0x1], 0  ;;  %s1117_s17 = smov 0   ;;  %s1119_s18 = smov 0  }
   0x5   :  { %s1121_s19 = smov 0   ;;  %s1123_s20 = smov 0  }
   0x6 LB: > { %s1138_s21 = sadd.s32 4294967295, %s1051_s20   ;;  %s858_s22 = sadd.s32 4294967294, %s1051_s20   ;;  %s1051_s20 = sphi %s1123_s20, %s1329_s20   ;;  %s1047_s19 = sphi %s1121_s19, %s1328_s19   ;;  %s1043_s18 = sphi %s1119_s18, %s1327_s18   ;;  %s1039_s17 = sphi %s1117_s17, %s1326_s17  }
   0x7   : > { %s1142_s23 = sadd.s32 1, %s1051_s20   ;;  %s267_s24 = sadd.s32 1, %s1047_s19 }
   0x8   : > { %s264_s25 = ssub.s32 %s1051_s20, %s1142_s23  ;;  %p277_p0 = scmp.ne.s32.totalorder %s1047_s19, %s1043_s18 }
   0x9   : > { %p265_p1 = scmp.eq.s32.totalorder %s264_s25, 0  ;;  %p278_p2 = scmp.eq.s32.totalorder %s1138_s21, 1 }
   0xa   : > { %p283_p3 = scmp.ne.s32.totalorder %s1043_s18, %s1039_s17  ;;  %p284_p4 = scmp.eq.s32.totalorder %s858_s22, 1 }
   0xb   : > { %s1153_s26 = scalar_select %p265_p1, %s1047_s19, %s267_s24  }
   0xc   : > { %p1155_p5 = por %p278_p2, %p277_p0  ;;  %p1159_p6 = por %p284_p4, %p283_p3 }
   0xd   : > { %p861_p7 = scmp.ge.s32.totalorder %s1051_s20, 1  ;;  %p339_p8 = scmp.lt.s32.totalorder %s1051_s20, 3 }
   0xf   : > { %p340_p9 = pnand %p861_p7, %p339_p8 }
  0x10   : > { %p378_p10 = scmp.lt.s32.totalorder (!%p340_p9), %s1138_s21, 1  ;;  %s1324_s1 = sld [smem:[#allocation7_spill]] (!%p340_p9) }
  0x11   : > { %343 = sbr.rel (%p340_p9) target bundleno = 1183 (0x49f), region = 64  ;;  %s1325_s0 = sld [smem:[#allocation6_spill]] (!%p340_p9) }
  0x12   : > { %s874_s30 = sshll.u32 (!%p340_p9), %s1138_s21, 7 }
  0x13   : > { %s1272_s16 = scalar_lea.hbm (!%p340_p9), %s1319_s11, %s874_s30 }
  0x16   : > { %v382_v0 = vld [vmem:[%s1324_s1] sm:$0xff]  ;;  %vm399_vm0 = vcmask 64512   ;;  %v386_v1 = vld [vmem:[%s1310_s2 + $0x8] sm:$0xff]  ;;  %v1053_v2 = vmov 0   ;;  %s379_s14 = scalar_select %p378_p10, %s1138_s21, 1  ;;  %v1054_v6 = vmov 0.0  }
  0x17   : > { %899 = vmatprep.mubr.msk.f32.mxu0 %vm399_vm0, %v382_v0  ;;  %981 = vset.pattern.permute.xlu0 %v1053_v2  ;;  %v385_v3 = vld [vmem:[%s1310_s2] sm:$0xff]  ;;  %v383_v5 = vld [vmem:[%s1324_s1 + $0x8] sm:$0xff]  ;;  %vm1055_vm1 = vmmov 0   ;;  %vm496_vm2 = vcmask 130048   ;;  %vm571_vm3 = vcmask 261120   ;;  %v615_v37 = vld [vmem:[%s1315_s7 + $0x18] sm:$0xff] }
  0x18   : > { %396 = vperm.xlu0 %981, %v386_v1   ;;  %982 = vset.pattern.permute.xlu1 %v1053_v2  ;;  %s863_s22 = sshll.u32 %s379_s14, 3  ;;  %v387_v7 = vld [vmem:[%s1312_s4] sm:$0xff]  ;;  %v614_v38 = vld [vmem:[%s1315_s7 + $0x10] sm:$0xff]  ;;  %v613_v39 = vld [vmem:[%s1315_s7 + $0x8] sm:$0xff]  ;;  %vm709_vm4 = vcmask 523264   ;;  %s1056_s21 = smov [#allocation3]  }
  0x19   : > { %s381_s29 = scalar_lea.vmem %s1325_s0, %s863_s22  ;;  %920 = vmatprep.subr.mxu1 %v1054_v6  ;;  %936 = vmatprep.mubr.msk.f32.mxu1 %vm1055_vm1, %v1054_v6  ;;  %v384_v24 = vld [vmem:[%s1311_s3] sm:$0xff]  ;;  %v708_v50 = vld [vmem:[%s1317_s9 + $0x38] sm:$0xff]  ;;  %v707_v51 = vld [vmem:[%s1317_s9 + $0x30] sm:$0xff]  ;;  %s375_s22 = sand.u32 1, %s1043_s18  }
  0x1a   : > { %v388_v4 = vld [vmem:[%s381_s29] sm:$0xff]  ;;  %493 = vperm.xlu1 %982, %v387_v7   ;;  %921 = vmatpush3.msra.mxu1 %v708_v50  ;;  %v706_v52 = vld [vmem:[%s1317_s9 + $0x28] sm:$0xff]  ;;  %v704_v54 = vld [vmem:[%s1317_s9 + $0x18] sm:$0xff]  ;;  %s862_s24 = sshll.u32 %s375_s22, 3  ;;  %s786_s0 = scalar_lea.sflag [#allocation4], %s375_s22 }
  0x1b   : > { %897 = vmatprep.subr.mxu0 %v388_v4  ;;  %v612_v40 = vld [vmem:[%s1315_s7] sm:$0xff]  ;;  %922 = vmatprep.subr.mxu1 %v1054_v6  ;;  %v703_v55 = vld [vmem:[%s1317_s9 + $0x10] sm:$0xff]  ;;  %v702_v56 = vld [vmem:[%s1317_s9 + $0x8] sm:$0xff]  ;;  %s377_s12 = scalar_lea.vmem [#allocation3], %s862_s24  ;;  %s995_s24 = sshll.u32 %s1056_s21, 4  ;;  %s996_s24 = int_to_ptr.vmem [resolvable:$false] %s995_s24 }
  0x1c   : > { %391 = vperm.xlu0 %981, %v385_v3   ;;  %898 = vmatpush3.msra.mxu0 %v388_v4  ;;  %v867_v45 = vld [vmem:[%s1313_s5] ss:$0 sm:$0xff]  ;;  %s799_s13 = sshll.u32 %s377_s12, 4  ;;  %s997_s25 = scalar_lea.vmem %s996_s24, 256  ;;  %s800_s13 = int_to_ptr.vmem [resolvable:$true] %s799_s13 }
  0x1d   : > { %900 = vmatmul.mubr.msk.f32.vlgmr.msra.gmra.mxu0 %vm399_vm0, %v383_v5  ;;  %902 = vmatprep.subr.mxu0 %v1054_v6  ;;  %v868_v47 = vld [vmem:[%s1314_s6] ss:$0 sm:$0xff]  ;;  %s991_s1 = scalar_lea.vmem %s800_s13, 128  ;;  %p998_p0 = scmp.lt.s32.totalorder %s800_s13, %s996_s24 }
  0x1e   : > { %906 = vmatprep.mubr.msk.f32.mxu0 %vm1055_vm1, %v1054_v6  ;;  %923 = vmatpush3.msra.mxu1 %v707_v51  ;;  %v705_v53 = vld [vmem:[%s1317_s9 + $0x20] sm:$0xff]  ;;  %p992_p11 = scmp.ne.s32.totalorder %s800_s13, %s991_s1  ;;  %p999_p1 = scmp.lt.s32.totalorder %s997_s25, %s991_s1 }
  0x1f   : > { %924 = vmatprep.subr.mxu1 %v1054_v6  ;;  %v701_v57 = vld [vmem:[%s1317_s9] sm:$0xff] }
  0x20   : > { %925 = vmatpush3.msra.mxu1 %v706_v52  ;;  %v870_v58 = vld [vmem:[%s1316_s8] ss:$0 sm:$0xff]  ;;  %p993_p12 = pnand %p992_p11, %p1155_p5  ;;  %p1000_p2 = por %p999_p1, %p998_p0 }
  0x21   : > { %926 = vmatprep.subr.mxu1 %v1054_v6  ;;  %v869_v3 = vld [vmem:[%s1318_s10] ss:$0 sm:$0xff] }
  0x22   : > { %927 = vmatpush3.msra.mxu1 %v705_v53  ;;  %p994_p13 = pneg %p993_p12 }
  0x23   : > { %928 = vmatprep.subr.mxu1 %v1054_v6 }
  0x24   : > { %929 = vmatpush3.msra.mxu1 %v704_v54  ;;  %p1001_p3 = pnand %p1000_p2, %p994_p13 }
  0x25   : > { %930 = vmatprep.subr.mxu1 %v1054_v6 }
  0x26   : > { %931 = vmatpush3.msra.mxu1 %v703_v55 }
  0x27   : > { %932 = vmatprep.subr.mxu1 %v1054_v6 }
  0x28   : > { %933 = vmatpush3.msra.mxu1 %v702_v56 }
  0x29   : > { %934 = vmatprep.subr.mxu1 %v1054_v6 }
  0x2a   : > { %935 = vmatpush3.msra.mxu1 %v701_v57 }
  0x93   : > { %v397_v8 = vpop.permute.xlu0 %396 }
  0x95   : > { %v494_v25 = vpop.permute.xlu1 %493 }
  0x97   : > { %v392_v11 = vpop.permute.xlu0 %391 }
  0xdd   : > { %v901_v9 = vpop.f32.mrf.mxu0 }
  0xde   : > { %v478_v10 = vadd.f32 %v901_v9, %v397_v8 }
  0xdf   : > { %v472_v12 = vpop.f32.mrf.mxu0 }
  0xe0   : > { %v484_v13 = vmul.f32 0.70710677, %v478_v10  ;;  %v473_v14 = vadd.f32 %v472_v12, %v392_v11  ;;  %v482_v17 = vmul.f32 0.5, %v478_v10 }
  0xe2   : > { %983 = verf.f32 %v484_v13  ;;  %v483_v15 = vmul.f32 0.70710677, %v473_v14  ;;  %v481_v21 = vmul.f32 0.5, %v473_v14 }
  0xe4   : > { %985 = verf.f32 %v483_v15 }
  0xef   : > { %v984_v16 = vpop.eup %983 }
  0xf0   : > { %v488_v18 = vadd.f32 1.0, %v984_v16 }
  0xf1   : > { %v986_v19 = vpop.eup %985 }
  0xf2   : > { %v490_v20 = vmul.f32 %v488_v18, %v482_v17  ;;  %v487_v22 = vadd.f32 1.0, %v986_v19 }
  0xf4   : > { %v489_v23 = vmul.f32 %v487_v22, %v481_v21  ;;  %903 = vmatpush3.msra.mxu0 %v490_v20 }
  0xf5   : > { %904 = vmatprep.subr.mxu0 %v1054_v6 }
  0xf6   : > { %905 = vmatpush3.msra.mxu0 %v489_v23 }
  0xf7   : > { %907 = vmatmul.mubr.msk.f32.vlgmr.msra.gmra.mxu0 %vm496_vm2, %v384_v24  ;;  %909 = vmatprep.subr.mxu0 %v1054_v6 }
  0xf8   : > { %917 = vmatprep.mubr.msk.f32.mxu0 %vm1055_vm1, %v1054_v6  ;;  %910 = vmatpush3.msra.mxu0 %v615_v37 }
  0xf9   : > { %911 = vmatprep.subr.mxu0 %v1054_v6 }
  0xfa   : > { %912 = vmatpush3.msra.mxu0 %v614_v38 }
  0xfb   : > { %913 = vmatprep.subr.mxu0 %v1054_v6 }
  0xfc   : > { %914 = vmatpush3.msra.mxu0 %v613_v39 }
  0xfd   : > { %915 = vmatprep.subr.mxu0 %v1054_v6 }
  0xfe   : > { %916 = vmatpush3.msra.mxu0 %v612_v40 }
 0x1b7   : > { %v566_v26 = vpop.f32.mrf.mxu0 }
 0x1b8   : > { %v567_v27 = vadd.f32 %v566_v26, %v494_v25 }
 0x1b9   : > { %v908_v28 = vpop.f32.mrf.mxu0 }
 0x1ba   : > { %v570_v29 = vadd.f32 %v567_v27, %v388_v4 }
 0x1bc   : > { %572 = vst.msk [vmem:[#allocation2] sm:$0xff] %vm571_vm3, %v570_v29 }
 0x1c3   : > { %v1201_v30 = vld [vmem:[#allocation2] sm:$0xff] }
 0x1c4   : > { %v574_v31 = vsel %vm571_vm3, %v1201_v30, 0.0  ;;  %v611_v4 = vadd.f32 %v869_v3, %v1201_v30 }
 0x1c5   : > { %575 = vadd.xlane.f32.xlu1 %v574_v31 }
 0x24e   : > { %v576_v32 = vpop.xlane.xlu1 %575 }
 0x24f   : > { %v578_v33 = vmul.f32 0.03125, %v576_v32 }
 0x251   : > { %v579_v34 = vsub.f32 %v1201_v30, %v578_v33 }
 0x253   : > { %v580_v35 = vmul.f32 %v579_v34, %v579_v34 }
 0x255   : > { %v581_v36 = vsel %vm571_vm3, %v580_v35, 0.0 }
 0x256   : > { %582 = vadd.xlane.f32.xlu0 %v581_v36 }
 0x2df   : > { %v583_v41 = vpop.xlane.xlu0 %582 }
 0x2e0   : > { %v584_v42 = vmul.f32 0.03125, %v583_v41 }
 0x2e2   : > { %v585_v43 = vadd.f32 1e-05, %v584_v42 }
 0x2e4   : > { %987 = vrsqrt.f32 %v585_v43 }
 0x2f1   : > { %v988_v44 = vpop.eup %987 }
 0x2f2   : > { %v587_v46 = vmul.f32 %v988_v44, %v579_v34 }
 0x2f4   : > { %v595_v48 = vmul.f32 %v867_v45, %v587_v46 }
 0x2f6   : > { %v603_v49 = vadd.f32 %v868_v47, %v595_v48 }
 0x2f8   : > { %918 = vmatmul.mubr.msk.f32.vlgmr.msra.gmra.mxu0 %vm571_vm3, %v603_v49 }
 0x3b8   : > { %v692_v59 = vpop.f32.mrf.mxu0 }
 0x3b9   : > { %v693_v60 = vadd.f32 %v870_v58, %v692_v59 }
 0x3ba   : > { %v919_v61 = vpop.f32.mrf.mxu0 }
 0x3bb   : > { %v697_v62 = vmul.f32 0.70710677, %v693_v60  ;;  %v696_v0 = vmul.f32 0.5, %v693_v60 }
 0x3bd   : > { %989 = verf.f32 %v697_v62 }
 0x3ca   : > { %v990_v63 = vpop.eup %989 }
 0x3cb   : > { %v699_v1 = vadd.f32 1.0, %v990_v63 }
 0x3cd   : > { %v700_v2 = vmul.f32 %v699_v1, %v696_v0 }
 0x3cf   : > { %937 = vmatmul.mubr.msk.f32.vlgmr.msra.gmra.mxu1 %vm709_vm4, %v700_v2 }
 0x48f   : > { %v779_v5 = vpop.f32.mrf.mxu1 }
 0x490   : > { %v783_v6 = vadd.f32 %v779_v5, %v611_v4 }
 0x491   : > { %v938_v7 = vpop.f32.mrf.mxu1 }
 0x492   : > { %784 = vst.msk [vmem:[%s377_s12] sm:$0xff] %vm571_vm3, %v783_v6 }
 0x493   : > { %1004 = shalt.err (!%p1001_p3)
}
 0x494   : > { %s1005_s29 = scalar_lea.hbm %s1272_s16, 128  ;;  %s1009_s12 = scalar_lea.hbm %s1319_s11, 256 }
 0x495   : > { %p1006_p4 = scmp.ne.s32.totalorder %s1272_s16, %s1005_s29  ;;  %p1010_p9 = scmp.lt.s32.totalorder %s1272_s16, %s1319_s11 }
 0x496   : > { %p1011_p10 = scmp.lt.s32.totalorder %s1009_s12, %s1005_s29 }
 0x497   : > { %p1007_p7 = pnand %p1006_p4, %p1155_p5 }
 0x498   : > { %p1012_p11 = por %p1011_p10, %p1010_p9 }
 0x499   : > { %p1008_p8 = pneg %p1007_p7 }
 0x49b   : > { %p1013_p12 = pnand %p1012_p11, %p1008_p8 }
 0x49d   : > { %1016 = shalt.err (!%p1013_p12)
}
 0x49e   : > { %939 = dma.vmem_to_hbm [thread:$0]  (%p1155_p5), %s800_s13, 128, %s1272_s16, %s786_s0  }
 0x49f PF: > { %p945_p13 = scmp.ge.s32.totalorder %s1051_s20, 2  ;;  %s811_s1 = sand.u32 1, %s1039_s17  }
 0x4a0   : > { %s812_s21 = scalar_lea.sflag [#allocation4], %s811_s1 }
 0x4a1   : > { %p942_p0 = pnand %p945_p13, %p1159_p6 }
 0x4a3   : > { %p943_p1 = pneg %p942_p0 }
 0x4a5   : > { %1034 = dma.done.wait (%p943_p1), %s812_s21, 128  }
 0x4a6   : > { %1036 = vsyncadd (%p943_p1), %s812_s21, 4294967168  ;;  %p21_p2 = scmp.ge.s32.totalorder %s1142_s23, 4   ;;  %s1326_s17 = smov %s1043_s18 }
 0x4a7   : > { %s1327_s18 = smov %s1047_s19  ;;  %s1328_s19 = smov %s1153_s26 }
 0x4a8   : > { %s1329_s20 = smov %s1142_s23  ;;  %23 = sbr.rel (!%p21_p2) target bundleno = 6 (0x6), region = 99 }
 0x4ad   :  { %817 = vsyncpa [#allocation4], 1 }
 0x4ae   :  { %819 = vsyncpa [#allocation4 + $0x1], 1 }

</bundles_post_ra>
